<compile_context>
chip_gen: v7x
topology: tpu7x:2x2x1
jax: 0.10.0
libtpu: 0.0.40
codegen_flags: <defaults>
</compile_context>

<pallas_src>
import jax
import jax.numpy as jnp
from jax import lax
from jax.experimental import pallas as pl
from jax.experimental.pallas import tpu as pltpu

LN_EPS = 1e-12
_INV_SQRT2 = 0.7071067811865476


def mlm_kernel(hs_ref, wdt_ref, bd_ref, gamma_ref, beta_ref, emb_ref, bvoc_ref,
               out_ref, x_ref):
    # ---- Phase 1 (once per row tile, j == 0): dense -> GELU -> LayerNorm ----
    @pl.when(pl.program_id(1) == 0)
    def _():
        # dense_w pre-transposed to [in, out] in the wrapper -> plain NN matmul.
        x = jnp.dot(hs_ref[...], wdt_ref[...],
                    preferred_element_type=jnp.float32)      # (TM, H) f32
        x = x + bd_ref[...]                                   # (1, H) broadcast
        # Exact erf-based GELU (torch.nn.GELU default), f32.
        x = 0.5 * x * (1.0 + lax.erf(x * _INV_SQRT2))
        # LayerNorm over the last dim, eps = 1e-12, f32.
        mean = jnp.mean(x, axis=-1, keepdims=True)
        xc = x - mean
        var = jnp.mean(xc * xc, axis=-1, keepdims=True)
        x = xc * lax.rsqrt(var + LN_EPS)
        # Store already cast to the compute dtype -> no per-(i, j) cast below.
        x_ref[...] = (x * gamma_ref[...] + beta_ref[...]).astype(x_ref.dtype)

    # ---- Phase 2 (every (i, j)): logits tile = x @ E_tile^T + bias tile -----
    logits = lax.dot_general(x_ref[...], emb_ref[...],
                             (((1,), (1,)), ((), ())),        # NT, MXU-native
                             preferred_element_type=jnp.float32)  # (TM, TV)
    out_ref[...] = (logits + bvoc_ref[...]).astype(out_ref.dtype)


def _round_down_tile(total, preferred, align):
    """Largest sensible tile <= preferred (aligned), or the full dim if small."""
    if total <= preferred:
        return total
    return min(total, max(align, (preferred // align) * align))


def _vmem_budget_bytes():
    """Generation-aware per-core VMEM budget (capacity minus headroom)."""
    cap = 64 << 20                                   # conservative fallback (v7x)
    try:
        info = pltpu.get_tpu_info()
        cap = int(getattr(info, "vmem_capacity_bytes", cap) or cap)
    except Exception:
        pass
    # ~12.5% (>= 8 MiB) headroom: ~56 MiB on v7x, ~112 MiB on v5e/v6e.
    return cap - max(cap // 8, 8 << 20)


def mlm_layer(hidden_states, embedding_weights, params, *, tm=512, tv=1024,
              weight_dtype=None, out_dtype=None):
    """hidden_states: [B, S, H], embedding_weights: [V, H] -> logits [B, S, V]."""
    B, S, H = hidden_states.shape
    V, He = embedding_weights.shape
    assert He == H
    M = B * S

    # Row tile / vocab tile: 128-aligned (defaults are 256-aligned for the
    # v6e/v7x 2x256 MXU; 128 keeps v5e's 4x128 MXU happy).  Pad M / V up so
    # the grid always tiles cleanly; padding is sliced off at the end.
    tm = _round_down_tile(M, tm, 128)
    tv = _round_down_tile(V, tv, 128)
    Mp = pl.cdiv(M, tm) * tm
    Vp = pl.cdiv(V, tv) * tv

    if weight_dtype is None:
        weight_dtype = jnp.result_type(params["dense_w"].dtype,
                                       embedding_weights.dtype)
    compute_dtype = jnp.dtype(weight_dtype)
    out_dtype = jnp.dtype(jnp.float32 if out_dtype is None else out_dtype)

    # One-time layout / dtype prep in the wrapper (outside the hot loop).
    hs2d = hidden_states.reshape(M, H).astype(compute_dtype)
    if Mp != M:
        hs2d = jnp.pad(hs2d, ((0, Mp - M), (0, 0)))
    wdt = params["dense_w"].astype(compute_dtype).T            # (H_in, H_out)
    emb = embedding_weights.astype(compute_dtype)              # (V, H)
    bd = params["dense_b"].astype(jnp.float32).reshape(1, H)
    gamma = params["ln_gamma"].astype(jnp.float32).reshape(1, H)
    beta = params["ln_beta"].astype(jnp.float32).reshape(1, H)
    bvoc = params["vocab_bias"].astype(jnp.float32)
    if Vp != V:
        emb = jnp.pad(emb, ((0, Vp - V), (0, 0)))
        bvoc = jnp.pad(bvoc, ((0, Vp - V),))
    bvoc = bvoc.reshape(1, Vp)

    grid = (Mp // tm, Vp // tv)
    n_row_tiles = Mp // tm

    # VMEM footprint (default double-buffered tiles + resident scratch),
    # checked against the generation-aware budget — fail loudly, don't shrink.
    it_c = jnp.dtype(compute_dtype).itemsize
    it_o = jnp.dtype(out_dtype).itemsize
    est = (2 * tm * H * it_c            # activation row tile
           + 2 * H * H * it_c           # dense weight (constant index map)
           + 2 * 3 * H * 4              # dense bias / gamma / beta
           + 2 * tv * H * it_c          # embedding tile (dominant stream)
           + 2 * tv * 4                 # vocab-bias tile
           + 2 * tm * tv * it_o         # output tile
           + tm * H * it_c)             # post-LN scratch (compute dtype)
    budget = _vmem_budget_bytes()
    if est > budget:
        raise ValueError(
            f"MlmLayer tiles need ~{est >> 20} MiB VMEM but the per-core "
            f"budget is ~{budget >> 20} MiB; reduce tm ({tm}) / tv ({tv}).")
    vmem_limit = int(min(budget, max(32 << 20, est + (8 << 20))))

    cost = pl.CostEstimate(
        flops=2 * Mp * H * (H + Vp),
        transcendentals=Mp * H,
        bytes_accessed=(Mp * H * it_c                 # activations in
                        + H * H * it_c                # dense weight
                        + n_row_tiles * Vp * H * it_c # E re-streamed per row tile
                        + Mp * Vp * it_o              # logits writeback
                        + Vp * 4 + 3 * H * 4))

    out = pl.pallas_call(
        mlm_kernel,
        out_shape=jax.ShapeDtypeStruct((Mp, Vp), out_dtype),
        grid_spec=pltpu.PrefetchScalarGridSpec(
            num_scalar_prefetch=0,
            grid=grid,
            in_specs=[
                pl.BlockSpec((tm, H), lambda i, j: (i, 0)),   # activation tile
                pl.BlockSpec((H, H), lambda i, j: (0, 0)),    # dense W [in,out]
                pl.BlockSpec((1, H), lambda i, j: (0, 0)),    # dense bias
                pl.BlockSpec((1, H), lambda i, j: (0, 0)),    # LN gamma
                pl.BlockSpec((1, H), lambda i, j: (0, 0)),    # LN beta
                pl.BlockSpec((tv, H), lambda i, j: (j, 0)),   # embedding tile
                pl.BlockSpec((1, tv), lambda i, j: (0, j)),   # vocab bias tile
            ],
            out_specs=pl.BlockSpec((tm, tv), lambda i, j: (i, j)),
            scratch_shapes=[pltpu.VMEM((tm, H), compute_dtype)],
        ),
        compiler_params=pltpu.CompilerParams(
            # Row axis parallel (megacore); vocab axis MUST stay the trailing
            # "arbitrary" axis so the post-LN scratch written at j==0 is valid.
            dimension_semantics=("parallel", "arbitrary"),
            vmem_limit_bytes=vmem_limit),
        cost_estimate=cost,
    )(hs2d, wdt, bd, gamma, beta, emb, bvoc)

    if Mp != M or Vp != V:
        out = out[:M, :V]
    return out.reshape(B, S, V)


def make_params(key, hidden_size, vocab_size, initializer_range=0.02):
    kw, kb = jax.random.split(key)
    # trunc_normal_(dense.weight, std=0.02, a=-0.04, b=0.04) == +/- 2 std
    dense_w = initializer_range * jax.random.truncated_normal(
        kw, -2.0, 2.0, (hidden_size, hidden_size), dtype=jnp.float32)
    # nn.Linear default bias init: U(-1/sqrt(fan_in), 1/sqrt(fan_in))
    bound = 1.0 / (hidden_size ** 0.5)
    dense_b = jax.random.uniform(kb, (hidden_size,), jnp.float32, -bound, bound)
    return {
        "dense_w": dense_w,
        "dense_b": dense_b,
        "ln_gamma": jnp.ones((hidden_size,), jnp.float32),
        "ln_beta": jnp.zeros((hidden_size,), jnp.float32),
        "vocab_bias": jnp.zeros((vocab_size,), jnp.float32),
    }


def mlm_layer_ref(hidden_states, embedding_weights, params):
    """Pure-JAX reference mirroring the PyTorch forward."""
    x = hidden_states @ params["dense_w"].T + params["dense_b"]
    x = 0.5 * x * (1.0 + lax.erf(x * _INV_SQRT2))
    mean = jnp.mean(x, axis=-1, keepdims=True)
    var = jnp.mean((x - mean) ** 2, axis=-1, keepdims=True)
    x = (x - mean) / jnp.sqrt(var + LN_EPS)
    x = x * params["ln_gamma"] + params["ln_beta"]
    return x @ embedding_weights.T + params["vocab_bias"]


if __name__ == "__main__":
    key = jax.random.PRNGKey(0)

    # --- case 1: small shapes, f32 compute, single-tile grid ------------------
    B, S, H, V = 2, 8, 32, 128
    k_hs, k_emb, k_par = jax.random.split(key, 3)
    hidden_states = jax.random.normal(k_hs, (B, S, H), dtype=jnp.float32)
    embedding_weights = jax.random.normal(k_emb, (V, H), dtype=jnp.float32) * 0.02
    params = make_params(k_par, H, V)

    logits = jax.block_until_ready(
        mlm_layer(hidden_states, embedding_weights, params))
    ref = mlm_layer_ref(hidden_states, embedding_weights, params)
    assert logits.shape == (B, S, V)
    assert jnp.allclose(logits, ref, atol=1e-4, rtol=1e-4), "f32 mismatch"

    # --- case 2: bf16 compute dtype + bf16 logits (halved HBM streams) --------
    logits_bf16 = jax.block_until_ready(
        mlm_layer(hidden_states, embedding_weights, params,
                  weight_dtype=jnp.bfloat16, out_dtype=jnp.bfloat16))
    assert logits_bf16.dtype == jnp.bfloat16
    assert jnp.allclose(logits_bf16.astype(jnp.float32), ref,
                        atol=3e-2, rtol=3e-2), "bf16 mismatch"

    # --- case 3: multi-tile grid (2 row tiles x 3 vocab tiles) + V padding ----
    B2, S2, V2 = 2, 128, 300   # M=256 -> 2 row tiles; V=300 padded to 384
    k_hs2, k_emb2, k_par2 = jax.random.split(jax.random.PRNGKey(1), 3)
    hs2 = jax.random.normal(k_hs2, (B2, S2, H), dtype=jnp.float32)
    emb2 = jax.random.normal(k_emb2, (V2, H), dtype=jnp.float32) * 0.02
    params2 = make_params(k_par2, H, V2)
    logits2 = jax.block_until_ready(
        mlm_layer(hs2, emb2, params2, tm=128, tv=128))     # grid = (2, 3)
    ref2 = mlm_layer_ref(hs2, emb2, params2)
    assert logits2.shape == (B2, S2, V2)
    assert jnp.allclose(logits2, ref2, atol=1e-4, rtol=1e-4), "tiled mismatch"

    print("KERNEL_OK")
</pallas_src>

<mosaic_0001>
module attributes {stable_mosaic.version = 11 : i64} {
  func.func @mlm_kernel(%arg0: i32, %arg1: i32, %arg2: memref<16x32xf32, #tpu.memory_space<vmem>>, %arg3: memref<32x32xf32, #tpu.memory_space<vmem>>, %arg4: memref<1x32xf32, #tpu.memory_space<vmem>>, %arg5: memref<1x32xf32, #tpu.memory_space<vmem>>, %arg6: memref<1x32xf32, #tpu.memory_space<vmem>>, %arg7: memref<128x32xf32, #tpu.memory_space<vmem>>, %arg8: memref<1x128xf32, #tpu.memory_space<vmem>>, %arg9: memref<16x128xf32, #tpu.memory_space<vmem>>, %arg10: memref<16x32xf32, #tpu.memory_space<vmem>>) attributes {dimension_semantics = [#tpu.dimension_semantics<parallel>, #tpu.dimension_semantics<arbitrary>], iteration_bounds = array<i64: 1, 1>, scalar_prefetch = 0 : i64, scratch_operands = 1 : i64, tpu.core_type = #tpu.core_type<tc>, window_params = [{transform_indices = @transform_0, window_bounds = array<i64: 16, 32>}, {pipeline_mode = #tpu.pipeline_mode<synchronous>, transform_indices = @transform_1, window_bounds = array<i64: 32, 32>}, {pipeline_mode = #tpu.pipeline_mode<synchronous>, transform_indices = @transform_2, window_bounds = array<i64: 1, 32>}, {pipeline_mode = #tpu.pipeline_mode<synchronous>, transform_indices = @transform_3, window_bounds = array<i64: 1, 32>}, {pipeline_mode = #tpu.pipeline_mode<synchronous>, transform_indices = @transform_4, window_bounds = array<i64: 1, 32>}, {transform_indices = @transform_5, window_bounds = array<i64: 128, 32>}, {transform_indices = @transform_6, window_bounds = array<i64: 1, 128>}, {transform_indices = @transform_7, window_bounds = array<i64: 16, 128>}]} {
    %c0_i32 = arith.constant 0 : i32
    %0 = arith.cmpi eq, %arg1, %c0_i32 : i32
    %1 = arith.extui %0 : i1 to i32
    %c0_i32_0 = arith.constant 0 : i32
    %2 = arith.cmpi ne, %1, %c0_i32_0 : i32
    scf.if %2 {
      %c0_8 = arith.constant 0 : index
      %c0_9 = arith.constant 0 : index
      %10 = vector.load %arg2[%c0_8, %c0_9] : memref<16x32xf32, #tpu.memory_space<vmem>>, vector<16x32xf32>
      %c0_10 = arith.constant 0 : index
      %c0_11 = arith.constant 0 : index
      %11 = vector.load %arg3[%c0_10, %c0_11] : memref<32x32xf32, #tpu.memory_space<vmem>>, vector<32x32xf32>
      %cst_12 = arith.constant dense<0.000000e+00> : vector<16x32xf32>
      %12 = tpu.matmul %10, %11, %cst_12 {dimension_numbers = #tpu.dot_dimension_numbers<[1], [0], [0], [1], [0, 0, 1, 1], [], []>} : vector<16x32xf32>, vector<32x32xf32>, vector<16x32xf32> -> vector<16x32xf32>
      %c0_13 = arith.constant 0 : index
      %c0_14 = arith.constant 0 : index
      %13 = vector.load %arg4[%c0_13, %c0_14] : memref<1x32xf32, #tpu.memory_space<vmem>>, vector<1x32xf32>
      %14 = vector.broadcast %13 : vector<1x32xf32> to vector<16x32xf32>
      %15 = arith.addf %12, %14 : vector<16x32xf32>
      %cst_15 = arith.constant 5.000000e-01 : f32
      %16 = vector.broadcast %cst_15 : f32 to vector<16x32xf32>
      %17 = arith.mulf %16, %15 : vector<16x32xf32>
      %cst_16 = arith.constant 0.707106769 : f32
      %18 = vector.broadcast %cst_16 : f32 to vector<16x32xf32>
      %19 = arith.mulf %15, %18 : vector<16x32xf32>
      %20 = math.erf %19 : vector<16x32xf32>
      %cst_17 = arith.constant 1.000000e+00 : f32
      %21 = vector.broadcast %cst_17 : f32 to vector<16x32xf32>
      %22 = arith.addf %21, %20 : vector<16x32xf32>
      %23 = arith.mulf %17, %22 : vector<16x32xf32>
      %cst_18 = arith.constant dense<0.000000e+00> : vector<16xf32>
      %24 = vector.multi_reduction <add>, %23, %cst_18 [1] : vector<16x32xf32> to vector<16xf32>
      %25 = vector.shape_cast %24 : vector<16xf32> to vector<16x1xf32>
      %cst_19 = arith.constant 3.200000e+01 : f32
      %26 = vector.broadcast %cst_19 : f32 to vector<16x1xf32>
      %27 = arith.divf %25, %26 : vector<16x1xf32>
      %28 = vector.broadcast %27 : vector<16x1xf32> to vector<16x32xf32>
      %29 = arith.subf %23, %28 : vector<16x32xf32>
      %30 = arith.mulf %29, %29 : vector<16x32xf32>
      %cst_20 = arith.constant dense<0.000000e+00> : vector<16xf32>
      %31 = vector.multi_reduction <add>, %30, %cst_20 [1] : vector<16x32xf32> to vector<16xf32>
      %32 = vector.shape_cast %31 : vector<16xf32> to vector<16x1xf32>
      %cst_21 = arith.constant 3.200000e+01 : f32
      %33 = vector.broadcast %cst_21 : f32 to vector<16x1xf32>
      %34 = arith.divf %32, %33 : vector<16x1xf32>
      %cst_22 = arith.constant 9.99999996E-13 : f32
      %35 = vector.broadcast %cst_22 : f32 to vector<16x1xf32>
      %36 = arith.addf %34, %35 : vector<16x1xf32>
      %37 = math.rsqrt %36 : vector<16x1xf32>
      %38 = vector.broadcast %37 : vector<16x1xf32> to vector<16x32xf32>
      %39 = arith.mulf %29, %38 : vector<16x32xf32>
      %c0_23 = arith.constant 0 : index
      %c0_24 = arith.constant 0 : index
      %40 = vector.load %arg5[%c0_23, %c0_24] : memref<1x32xf32, #tpu.memory_space<vmem>>, vector<1x32xf32>
      %41 = vector.broadcast %40 : vector<1x32xf32> to vector<16x32xf32>
      %42 = arith.mulf %39, %41 : vector<16x32xf32>
      %c0_25 = arith.constant 0 : index
      %c0_26 = arith.constant 0 : index
      %43 = vector.load %arg6[%c0_25, %c0_26] : memref<1x32xf32, #tpu.memory_space<vmem>>, vector<1x32xf32>
      %44 = vector.broadcast %43 : vector<1x32xf32> to vector<16x32xf32>
      %45 = arith.addf %42, %44 : vector<16x32xf32>
      %c0_27 = arith.constant 0 : index
      %c0_28 = arith.constant 0 : index
      %46 = vector.load %arg10[%c0_27, %c0_28] : memref<16x32xf32, #tpu.memory_space<vmem>>, vector<16x32xf32>
      tpu.vector_store %arg10[%c0_27, %c0_28], %45 {strides = array<i32>} : memref<16x32xf32, #tpu.memory_space<vmem>>, vector<16x32xf32>,
    } else {
    }
    %c0 = arith.constant 0 : index
    %c0_1 = arith.constant 0 : index
    %3 = vector.load %arg10[%c0, %c0_1] : memref<16x32xf32, #tpu.memory_space<vmem>>, vector<16x32xf32>
    %c0_2 = arith.constant 0 : index
    %c0_3 = arith.constant 0 : index
    %4 = vector.load %arg7[%c0_2, %c0_3] : memref<128x32xf32, #tpu.memory_space<vmem>>, vector<128x32xf32>
    %cst = arith.constant dense<0.000000e+00> : vector<16x128xf32>
    %5 = tpu.matmul %3, %4, %cst {dimension_numbers = #tpu.dot_dimension_numbers<[1], [1], [0], [0], [0, 0, 1, 0], [], []>} : vector<16x32xf32>, vector<128x32xf32>, vector<16x128xf32> -> vector<16x128xf32>
    %c0_4 = arith.constant 0 : index
    %c0_5 = arith.constant 0 : index
    %6 = vector.load %arg8[%c0_4, %c0_5] : memref<1x128xf32, #tpu.memory_space<vmem>>, vector<1x128xf32>
    %7 = vector.broadcast %6 : vector<1x128xf32> to vector<16x128xf32>
    %8 = arith.addf %5, %7 : vector<16x128xf32>
    %c0_6 = arith.constant 0 : index
    %c0_7 = arith.constant 0 : index
    %9 = vector.load %arg9[%c0_6, %c0_7] : memref<16x128xf32, #tpu.memory_space<vmem>>, vector<16x128xf32>
    tpu.vector_store %arg9[%c0_6, %c0_7], %8 {strides = array<i32>} : memref<16x128xf32, #tpu.memory_space<vmem>>, vector<16x128xf32>,
    return
  }
  func.func @transform_0(%arg0: i32, %arg1: i32) -> (i32, i32) {
    %c0_i32 = arith.constant 0 : i32
    %c0_i32_0 = arith.constant 0 : i32
    return %arg0, %c0_i32 : i32, i32
  }
  func.func @transform_1(%arg0: i32, %arg1: i32) -> (i32, i32) {
    %c0_i32 = arith.constant 0 : i32
    %c0_i32_0 = arith.constant 0 : i32
    %c0_i32_1 = arith.constant 0 : i32
    return %c0_i32, %c0_i32_0 : i32, i32
  }
  func.func @transform_2(%arg0: i32, %arg1: i32) -> (i32, i32) {
    %c0_i32 = arith.constant 0 : i32
    %c0_i32_0 = arith.constant 0 : i32
    %c0_i32_1 = arith.constant 0 : i32
    return %c0_i32, %c0_i32_0 : i32, i32
  }
  func.func @transform_3(%arg0: i32, %arg1: i32) -> (i32, i32) {
    %c0_i32 = arith.constant 0 : i32
    %c0_i32_0 = arith.constant 0 : i32
    %c0_i32_1 = arith.constant 0 : i32
    return %c0_i32, %c0_i32_0 : i32, i32
  }
  func.func @transform_4(%arg0: i32, %arg1: i32) -> (i32, i32) {
    %c0_i32 = arith.constant 0 : i32
    %c0_i32_0 = arith.constant 0 : i32
    %c0_i32_1 = arith.constant 0 : i32
    return %c0_i32, %c0_i32_0 : i32, i32
  }
  func.func @transform_5(%arg0: i32, %arg1: i32) -> (i32, i32) {
    %c0_i32 = arith.constant 0 : i32
    %c0_i32_0 = arith.constant 0 : i32
    return %arg1, %c0_i32 : i32, i32
  }
  func.func @transform_6(%arg0: i32, %arg1: i32) -> (i32, i32) {
    %c0_i32 = arith.constant 0 : i32
    %c0_i32_0 = arith.constant 0 : i32
    return %c0_i32, %arg1 : i32, i32
  }
  func.func @transform_7(%arg0: i32, %arg1: i32) -> (i32, i32) {
    %c0_i32 = arith.constant 0 : i32
    return %arg0, %arg1 : i32, i32
  }
}

</mosaic_0001>

<bundles_post_ra>
// kernel: tpu_custom_call.1
= control target key start
LH: loop header
LB: loop body
LE: loop exit
PB: predicated region body
PF: predicated region fallthrough
CT: control target
= control target key end

     0   :  { %vm44_vm0 = vcmask 261120   ;;  %s722_s0 = inlined_call_operand.vmem [shape: f32[16,32], index: 0, kind: input, shape index: {}]   ;;  %s723_s1 = inlined_call_operand.vmem [shape: f32[32,32], index: 1, kind: input, shape index: {}]   ;;  %s724_s2 = inlined_call_operand.vmem [shape: f32[1,32], index: 2, kind: input, shape index: {}]   ;;  %s725_s3 = inlined_call_operand.vmem [shape: f32[1,32], index: 3, kind: input, shape index: {}]   ;;  %s726_s4 = inlined_call_operand.vmem [shape: f32[1,32], index: 4, kind: input, shape index: {}]   ;;  %s727_s5 = inlined_call_operand.vmem [shape: f32[128,32], index: 5, kind: input, shape index: {}]   ;;  %s728_s6 = inlined_call_operand.vmem [shape: f32[1,128], index: 6, kind: input, shape index: {}]   ;;  %s729_s7 = inlined_call_operand.hbm [shape: f32[16,128], index: 7, kind: output, shape index: {}]  }
   0x1   :  { %v33_v0 = vld [vmem:[%s723_s1] sm:$0xff]  ;;  %v34_v1 = vld [vmem:[%s723_s1 + $0x8] sm:$0xff]  ;;  %v35_v2 = vld [vmem:[%s723_s1 + $0x10] sm:$0xff] }
   0x2   :  { %v450_v3 = vpack.c.bf16 %v34_v1, %v33_v0  ;;  %v36_v4 = vld [vmem:[%s723_s1 + $0x18] sm:$0xff]  ;;  %v31_v5 = vld [vmem:[%s722_s0] sm:$0xff] }
   0x3   :  { %v454_v6 = vpack.c.bf16 %v36_v4, %v35_v2  ;;  %412 = vmatprep.mubr.msk.f32.mxu0 %vm44_vm0, %v31_v5 }
   0x4   :  { %12 = vsyncpa [#allocation4], 0  ;;  %451 = vmatprep.subr.bf16.mxu0 %v450_v3  ;;  %v32_v7 = vld [vmem:[%s722_s0 + $0x8] sm:$0xff]  ;;  %v356_v8 = vld [vmem:[%s724_s2] ss:$0 sm:$0xff] }
   0x5   :  { %453 = vmatpush3.bf16.msra.mxu0 %v450_v3  ;;  %vm611_vm1 = vmpackc.low %vm44_vm0, %vm44_vm0  ;;  %v185_v26 = vld [vmem:[%s727_s5] sm:$0xff]  ;;  %v186_v27 = vld [vmem:[%s727_s5 + $0x8] sm:$0xff] }
   0x6   :  { %455 = vmatprep.subr.bf16.mxu0 %v454_v6  ;;  %v187_v28 = vld [vmem:[%s727_s5 + $0x10] sm:$0xff]  ;;  %v458_v29 = vpack.c.bf16 %v186_v27, %v185_v26  ;;  %v188_v30 = vld [vmem:[%s727_s5 + $0x18] sm:$0xff]  ;;  %v189_v32 = vld [vmem:[%s727_s5 + $0x20] sm:$0xff] }
   0x7   :  { %v464_v31 = vpack.c.bf16 %v188_v30, %v187_v28  ;;  %v190_v33 = vld [vmem:[%s727_s5 + $0x28] sm:$0xff]  ;;  %v191_v35 = vld [vmem:[%s727_s5 + $0x30] sm:$0xff]  ;;  %v192_v36 = vld [vmem:[%s727_s5 + $0x38] sm:$0xff] }
   0x8   :  { %460 = vmatprep.subr.msk.bf16.mxu1 %vm611_vm1, %v458_v29  ;;  %v470_v34 = vpack.c.bf16 %v190_v33, %v189_v32  ;;  %v476_v37 = vpack.c.bf16 %v192_v36, %v191_v35  ;;  %v193_v48 = vld [vmem:[%s727_s5 + $0x40] sm:$0xff]  ;;  %v194_v49 = vld [vmem:[%s727_s5 + $0x48] sm:$0xff]  ;;  %v195_v51 = vld [vmem:[%s727_s5 + $0x50] sm:$0xff] }
   0x9   :  { %457 = vmatpush3.bf16.msra.mxu0 %v454_v6  ;;  %463 = vmatpush3.bf16.xpose.msk.msra.mxu1 %vm611_vm1, %v458_v29  ;;  %v482_v50 = vpack.c.bf16 %v194_v49, %v193_v48  ;;  %v196_v52 = vld [vmem:[%s727_s5 + $0x58] sm:$0xff]  ;;  %v197_v54 = vld [vmem:[%s727_s5 + $0x60] sm:$0xff]  ;;  %v198_v55 = vld [vmem:[%s727_s5 + $0x68] sm:$0xff] }
   0xa   :  { %466 = vmatprep.subr.msk.bf16.mxu1 %vm611_vm1, %v464_v31  ;;  %v488_v53 = vpack.c.bf16 %v196_v52, %v195_v51  ;;  %v494_v56 = vpack.c.bf16 %v198_v55, %v197_v54  ;;  %v199_v57 = vld [vmem:[%s727_s5 + $0x70] sm:$0xff]  ;;  %v200_v58 = vld [vmem:[%s727_s5 + $0x78] sm:$0xff]  ;;  %v359_v3 = vld [vmem:[%s725_s3] ss:$0 sm:$0xff] }
   0xb   :  { %v500_v59 = vpack.c.bf16 %v200_v58, %v199_v57  ;;  %v360_v5 = vld [vmem:[%s726_s4] ss:$0 sm:$0xff]  ;;  %s541_s4 = smov [#allocation3]  }
   0xc   :  { %413 = vmatmul.mubr.msk.f32.vlgmr.msra.gmra.mrb[0].mxu0 %vm44_vm0, %v32_v7  ;;  %s345_s22 = sshll.u32 %s541_s4, 4  ;;  %s346_s22 = int_to_ptr.vmem [resolvable:$true] %s345_s22 }
   0xd   :  { %s517_s23 = scalar_lea.vmem %s346_s22, 256  ;;  %p522_p1 = scmp.lt.s32.totalorder %s346_s22, %s346_s22 }
   0xe   :  { %p518_p0 = scmp.ne.s32.totalorder %s346_s22, %s517_s23  ;;  %p523_p2 = scmp.lt.s32.totalorder %s517_s23, %s517_s23 }
  0x10   :  { %p524_p3 = por %p523_p2, %p522_p1 }
  0x11   :  { %469 = vmatpush3.bf16.xpose.msk.msra.mxu1 %vm611_vm1, %v464_v31 }
  0x12   :  { %472 = vmatprep.subr.msk.bf16.mxu1 %vm611_vm1, %v470_v34  ;;  %p525_p4 = pnand %p524_p3, %p518_p0 }
  0x19   :  { %475 = vmatpush3.bf16.xpose.msk.msra.mxu1 %vm611_vm1, %v470_v34 }
  0x1a   :  { %478 = vmatprep.subr.msk.bf16.mxu1 %vm611_vm1, %v476_v37 }
  0x21   :  { %481 = vmatpush3.bf16.xpose.msk.msra.mxu1 %vm611_vm1, %v476_v37 }
  0x22   :  { %484 = vmatprep.subr.msk.bf16.mxu1 %vm611_vm1, %v482_v50 }
  0x29   :  { %487 = vmatpush3.bf16.xpose.msk.msra.mxu1 %vm611_vm1, %v482_v50 }
  0x2a   :  { %490 = vmatprep.subr.msk.bf16.mxu1 %vm611_vm1, %v488_v53 }
  0x31   :  { %493 = vmatpush3.bf16.xpose.msk.msra.mxu1 %vm611_vm1, %v488_v53 }
  0x32   :  { %496 = vmatprep.subr.msk.bf16.mxu1 %vm611_vm1, %v494_v56 }
  0x39   :  { %499 = vmatpush3.bf16.xpose.msk.msra.mxu1 %vm611_vm1, %v494_v56 }
  0x3a   :  { %502 = vmatprep.subr.msk.bf16.mxu1 %vm611_vm1, %v500_v59 }
  0x41   :  { %505 = vmatpush3.bf16.xpose.msk.msra.mxu1 %vm611_vm1, %v500_v59 }
  0xdf   :  { %v414_v9 = vpop.f32.mrb[0].mxu0 }
  0xe0   :  { %v123_v10 = vadd.f32 %v414_v9, %v356_v8  ;;  %v117_v11 = vpop.f32.mrb[1].mxu0 }
  0xe1   :  { %v118_v12 = vadd.f32 %v356_v8, %v117_v11 }
  0xe2   :  { %v129_v13 = vmul.f32 0.70710677, %v123_v10  ;;  %v127_v20 = vmul.f32 0.5, %v123_v10 }
  0xe3   :  { %v128_v14 = vmul.f32 0.70710677, %v118_v12  ;;  %v126_v17 = vmul.f32 0.5, %v118_v12 }
  0xe4   :  { %509 = verf.f32 %v129_v13 }
  0xe5   :  { %511 = verf.f32 %v128_v14  ;;  %v361_v14 = vld [vmem:[%s728_s6] ss:$0 sm:$0xff] }
  0xee   :  { %v510_v15 = vpop.eup %509 }
  0xef   :  { %v512_v16 = vpop.eup %511  ;;  %v133_v19 = vadd.f32 1.0, %v510_v15 }
  0xf0   :  { %v132_v18 = vadd.f32 1.0, %v512_v16 }
  0xf1   :  { %v135_v23 = vmul.f32 %v133_v19, %v127_v20 }
  0xf2   :  { %v134_v21 = vmul.f32 %v132_v18, %v126_v17 }
  0xf3   :  { %v139_v24 = vsel %vm44_vm0, %v135_v23, 0.0 }
  0xf4   :  { %v136_v22 = vsel %vm44_vm0, %v134_v21, 0.0 }
  0xf5   :  { %137 = vadd.xlane.f32.xlu0 %v136_v22 }
  0xf9   :  { %140 = vadd.xlane.f32.xlu0 %v139_v24 }
 0x182   :  { %v138_v38 = vpop.xlane.xlu0 %137 }
 0x183   :  { %v143_v39 = vmul.f32 0.03125, %v138_v38 }
 0x185   :  { %v145_v40 = vsub.f32 %v134_v21, %v143_v39 }
 0x186   :  { %v141_v41 = vpop.xlane.xlu0 %140 }
 0x187   :  { %v144_v42 = vmul.f32 0.03125, %v141_v41  ;;  %v147_v43 = vmul.f32 %v145_v40, %v145_v40 }
 0x189   :  { %v146_v44 = vsub.f32 %v135_v23, %v144_v42  ;;  %v149_v45 = vsel %vm44_vm0, %v147_v43, 0.0 }
 0x18a   :  { %150 = vadd.xlane.f32.xlu1 %v149_v45 }
 0x18b   :  { %v148_v46 = vmul.f32 %v146_v44, %v146_v44 }
 0x18d   :  { %v152_v47 = vsel %vm44_vm0, %v148_v46, 0.0 }
 0x18e   :  { %153 = vadd.xlane.f32.xlu1 %v152_v47 }
 0x217   :  { %v151_v60 = vpop.xlane.xlu1 %150 }
 0x218   :  { %v155_v61 = vmul.f32 0.03125, %v151_v60 }
 0x21a   :  { %v157_v62 = vadd.f32 1e-12, %v155_v61 }
 0x21b   :  { %v154_v63 = vpop.xlane.xlu1 %153 }
 0x21c   :  { %513 = vrsqrt.f32 %v157_v62  ;;  %v156_v0 = vmul.f32 0.03125, %v154_v63 }
 0x21e   :  { %v158_v1 = vadd.f32 1e-12, %v156_v0 }
 0x220   :  { %515 = vrsqrt.f32 %v158_v1 }
 0x226   :  { %v514_v2 = vpop.eup %513 }
 0x227   :  { %v161_v4 = vmul.f32 %v514_v2, %v145_v40 }
 0x229   :  { %v170_v6 = vmul.f32 %v359_v3, %v161_v4 }
 0x22a   :  { %v516_v7 = vpop.eup %515 }
 0x22b   :  { %v179_v8 = vadd.f32 %v360_v5, %v170_v6  ;;  %v162_v9 = vmul.f32 %v516_v7, %v146_v44 }
 0x22d   :  { %181 = vst.msk [vmem:[#allocation2] sm:$0xff] %vm44_vm0, %v179_v8  ;;  %v171_v10 = vmul.f32 %v359_v3, %v162_v9 }
 0x22f   :  { %v180_v11 = vadd.f32 %v360_v5, %v171_v10 }
 0x231   :  { %182 = vst.msk [vmem:[#allocation2 + $0x8] sm:$0xff] %vm44_vm0, %v180_v11 }
 0x234   :  { %v183_v12 = vld [vmem:[#allocation2] sm:$0xff] }
 0x235   :  { %447 = vmatprep.mubr.msk.f32.mxu1 %vm44_vm0, %v183_v12 }
 0x238   :  { %v184_v13 = vld [vmem:[#allocation2 + $0x8] sm:$0xff] }
 0x239   :  { %448 = vmatmul.mubr.msk.f32.vlgmr.msra.gmra.mrb[0].mxu1 %vm44_vm0, %v184_v13 }
 0x30c   :  { %v449_v15 = vpop.f32.mrb[0].mxu1 }
 0x30d   :  { %v335_v16 = vadd.f32 %v449_v15, %v361_v14  ;;  %v329_v17 = vpop.f32.mrb[1].mxu1 }
 0x30e   :  { %v330_v18 = vadd.f32 %v361_v14, %v329_v17 }
 0x30f   :  { %339 = vst [vmem:[#allocation3 + $0x8] sm:$0xff] %v335_v16 }
 0x310   :  { %338 = vst [vmem:[#allocation3] sm:$0xff] %v330_v18 }
 0x311   :  { %528 = shalt.err (!%p525_p4)
}
 0x312   :  { %s529_s6 = scalar_lea.hbm %s729_s7, 256 }
 0x313   :  { %p530_p5 = scmp.ne.s32.totalorder %s729_s7, %s529_s6  ;;  %p533_p6 = scmp.lt.u32.totalorder %s529_s6, %s729_s7 }
 0x315   :  { %p535_p7 = pnand %p533_p6, %p530_p5 }
 0x317   :  { %538 = shalt.err (!%p535_p7)
}
 0x318   :  { %s542_s30 = smov 128   ;;  %s543_s8 = smov 8  }
 0x319   :  { %351 = dma.vmem_to_hbm [thread:$0]  %s346_s22, 256, %s729_s7, [#allocation4], %s542_s30, %s542_s30, %s543_s8  }
 0x31a   :  { %539 = dma.done.wait [#allocation4], 256  }
 0x31b   :  { %540 = vsyncadd [#allocation4], 4294967040 }
 0x31c   :  { %355 = vsyncpa [#allocation4], 1 }

</bundles_post_ra>
